<compile_context>
chip_gen: v5e
topology: v5e:2x2
jax: 0.10.0
libtpu: 0.0.40
codegen_flags: <defaults>
</compile_context>

<pallas_src>
import functools

import jax
import jax.numpy as jnp
import numpy as np
from jax.experimental import pallas as pl
from jax.experimental.pallas import tpu as pltpu

# ---- model hyperparameters (the module's undefined globals, chosen here) ----
M = 10
NEURONS = 32
H_IN, W_IN = 5, M + 1          # 5 x 11 input spatial
H_OUT, W_OUT = 2, M - 2        # 2 x 8 conv output spatial
C_OUT = 3
KSIZE = 4
NPIX = H_IN * W_IN             # 55
FEAT = C_OUT * H_OUT * W_OUT   # 48


def _conv_as_matmul_indices():
    """Static scatter indices that place conv1.weight into a dense (FEAT, NPIX)
    matrix whose row order matches PyTorch's view(-1, 48): f = c*16 + h*8 + w."""
    rows, cols, widx = [], [], []
    for c in range(C_OUT):
        for h in range(H_OUT):
            for w in range(W_OUT):
                f = c * H_OUT * W_OUT + h * W_OUT + w
                for kh in range(KSIZE):
                    for kw in range(KSIZE):
                        rows.append(f)
                        cols.append((h + kh) * W_IN + (w + kw))
                        widx.append(c * KSIZE * KSIZE + kh * KSIZE + kw)
    return (np.asarray(rows, np.int32), np.asarray(cols, np.int32),
            np.asarray(widx, np.int32))


_ROWS, _COLS, _WIDX = _conv_as_matmul_indices()


def _mm(w_ref, x):
    """Weights-stationary matmul with f32 accumulation (operands may be bf16)."""
    return jnp.dot(w_ref[...], x.astype(w_ref.dtype),
                   preferred_element_type=jnp.float32)


def _rvtdcnn2_kernel(xT_ref, wcT_ref, bc_ref, w1_ref, b1_ref, w2_ref, b2_ref,
                     out_ref):
    """One batch tile, batch in lanes.

    xT_ref : (55, TB)   flattened input pixels (h*11 + w) x batch
    wcT_ref: (48, 55)   conv1 as a dense matrix, rows in c*16 + h*8 + w order
    bc_ref : (48, 1)    conv bias expanded per feature
    w1_ref : (32, 48)   fc1.weight (PyTorch (out, in) layout)
    b1_ref : (32, 1)
    w2_ref : (2, 32)    fc2.weight
    b2_ref : (2, 1)
    out_ref: (2, TB)    lane-dense output slab
    """
    feat = jnp.tanh(_mm(wcT_ref, xT_ref[...]) + bc_ref[...])   # (48, TB)
    h1 = jnp.tanh(_mm(w1_ref, feat) + b1_ref[...])             # (32, TB)
    out_ref[...] = _mm(w2_ref, h1) + b2_ref[...]               # (2, TB)


def _pick_tile_b(n):
    """Largest multiple-of-128 divisor of n (capped at 2048), preferring >= 2
    grid steps so v7x's two TensorCores both get work.  Falls back to the full
    batch for small / ragged n (full-extent block dims are always legal)."""
    if n % 128 != 0:
        return n
    cap = n // 2 if n >= 256 else n
    cap = max(128, min(2048, (cap // 128) * 128))
    for tile in range(cap, 0, -128):
        if n % tile == 0:
            return tile
    return n


@functools.partial(jax.jit, static_argnames=("use_bf16",))
def rvtdcnn2_forward(x, wconv, bconv, w1, b1, w2, b2, *, use_bf16=False):
    """x: (N, 1, 5, M+1) float32 NCHW (as in PyTorch).  Returns (N, 2) f32."""
    n = x.shape[0]
    tile_b = _pick_tile_b(n)

    # Flatten pixels and put batch in lanes: (N, 1, 5, 11) -> (55, N).
    xT = x.reshape(n, NPIX).T

    # conv1 -> dense (48, 55) im2col weight matrix + (48, 1) folded bias.
    wcT = jnp.zeros((FEAT, NPIX), jnp.float32).at[_ROWS, _COLS].set(
        wconv.reshape(-1)[_WIDX])
    bc = jnp.repeat(bconv.reshape(C_OUT), H_OUT * W_OUT).reshape(FEAT, 1)
    b1c = b1.reshape(NEURONS, 1)
    b2c = b2.reshape(2, 1)

    wdt = jnp.bfloat16 if use_bf16 else jnp.float32  # bf16 MXU path for v6e/v7x
    wcT, w1m, w2m = wcT.astype(wdt), w1.astype(wdt), w2.astype(wdt)

    outT = pl.pallas_call(
        _rvtdcnn2_kernel,
        out_shape=jax.ShapeDtypeStruct((2, n), jnp.float32),
        grid_spec=pltpu.PrefetchScalarGridSpec(
            num_scalar_prefetch=0,
            grid=(n // tile_b,),
            in_specs=[
                pl.BlockSpec((NPIX, tile_b), lambda i: (0, i)),
                pl.BlockSpec((FEAT, NPIX), lambda i: (0, 0)),
                pl.BlockSpec((FEAT, 1), lambda i: (0, 0)),
                pl.BlockSpec((NEURONS, FEAT), lambda i: (0, 0)),
                pl.BlockSpec((NEURONS, 1), lambda i: (0, 0)),
                pl.BlockSpec((2, NEURONS), lambda i: (0, 0)),
                pl.BlockSpec((2, 1), lambda i: (0, 0)),
            ],
            out_specs=pl.BlockSpec((2, tile_b), lambda i: (0, i)),
        ),
        compiler_params=pltpu.CompilerParams(
            dimension_semantics=("parallel",)),
    )(xT, wcT, bc, w1m, b1c, w2m, b2c)

    return outT.T   # (N, 2)


def _init_params(key):
    """PyTorch-default-style init (uniform +-1/sqrt(fan_in)), PyTorch layouts."""
    ks = jax.random.split(key, 6)

    def u(k, shape, fan_in):
        bound = 1.0 / np.sqrt(fan_in)
        return jax.random.uniform(k, shape, jnp.float32, -bound, bound)

    wconv = u(ks[0], (C_OUT, 1, KSIZE, KSIZE), KSIZE * KSIZE)  # conv1.weight
    bconv = u(ks[1], (C_OUT,), KSIZE * KSIZE)                  # conv1.bias
    w1 = u(ks[2], (NEURONS, FEAT), FEAT)                       # fc1.weight
    b1 = u(ks[3], (NEURONS,), FEAT)                            # fc1.bias
    w2 = u(ks[4], (2, NEURONS), NEURONS)                       # fc2.weight
    b2 = u(ks[5], (2,), NEURONS)                               # fc2.bias
    return wconv, bconv, w1, b1, w2, b2


def _reference_forward(x, wconv, bconv, w1, b1, w2, b2):
    """Pure-JAX reference matching the PyTorch forward exactly."""
    conv = jax.lax.conv_general_dilated(
        x, wconv, window_strides=(1, 1), padding="VALID",
        dimension_numbers=("NCHW", "OIHW", "NCHW"))
    conv = jnp.tanh(conv + bconv.reshape(1, C_OUT, 1, 1))
    feat = conv.reshape(x.shape[0], FEAT)
    h1 = jnp.tanh(feat @ w1.T + b1)
    return h1 @ w2.T + b2


if __name__ == "__main__":
    key = jax.random.PRNGKey(0)
    pkey, xkey = jax.random.split(key)
    params = _init_params(pkey)

    batch = 256   # -> tile_b = 128, grid = 2 (keeps both v7x TensorCores busy)
    x = jax.random.normal(xkey, (batch, 1, H_IN, W_IN), jnp.float32)

    out = jax.block_until_ready(rvtdcnn2_forward(x, *params))
    ref = jax.block_until_ready(_reference_forward(x, *params))

    np.testing.assert_allclose(np.asarray(out), np.asarray(ref),
                               rtol=1e-4, atol=1e-4)
    assert out.shape == (batch, 2)
    print("KERNEL_OK")
</pallas_src>

<mosaic_0001>
module attributes {stable_mosaic.version = 11 : i64} {
  func.func @_rvtdcnn2_kernel(%arg0: i32, %arg1: memref<55x128xf32, #tpu.memory_space<vmem>>, %arg2: memref<48x55xf32, #tpu.memory_space<vmem>>, %arg3: memref<48x1xf32, #tpu.memory_space<vmem>>, %arg4: memref<32x48xf32, #tpu.memory_space<vmem>>, %arg5: memref<32x1xf32, #tpu.memory_space<vmem>>, %arg6: memref<2x32xf32, #tpu.memory_space<vmem>>, %arg7: memref<2x1xf32, #tpu.memory_space<vmem>>, %arg8: memref<2x128xf32, #tpu.memory_space<vmem>>) attributes {dimension_semantics = [#tpu.dimension_semantics<parallel>], iteration_bounds = array<i64: 2>, scalar_prefetch = 0 : i64, scratch_operands = 0 : i64, tpu.core_type = #tpu.core_type<tc>, window_params = [{transform_indices = @transform_0, window_bounds = array<i64: 55, 128>}, {pipeline_mode = #tpu.pipeline_mode<synchronous>, transform_indices = @transform_1, window_bounds = array<i64: 48, 55>}, {pipeline_mode = #tpu.pipeline_mode<synchronous>, transform_indices = @transform_2, window_bounds = array<i64: 48, 1>}, {pipeline_mode = #tpu.pipeline_mode<synchronous>, transform_indices = @transform_3, window_bounds = array<i64: 32, 48>}, {pipeline_mode = #tpu.pipeline_mode<synchronous>, transform_indices = @transform_4, window_bounds = array<i64: 32, 1>}, {pipeline_mode = #tpu.pipeline_mode<synchronous>, transform_indices = @transform_5, window_bounds = array<i64: 2, 32>}, {pipeline_mode = #tpu.pipeline_mode<synchronous>, transform_indices = @transform_6, window_bounds = array<i64: 2, 1>}, {transform_indices = @transform_7, window_bounds = array<i64: 2, 128>}]} {
    %c0 = arith.constant 0 : index
    %c0_0 = arith.constant 0 : index
    %0 = vector.load %arg1[%c0, %c0_0] : memref<55x128xf32, #tpu.memory_space<vmem>>, vector<55x128xf32>
    %c0_1 = arith.constant 0 : index
    %c0_2 = arith.constant 0 : index
    %1 = vector.load %arg2[%c0_1, %c0_2] : memref<48x55xf32, #tpu.memory_space<vmem>>, vector<48x55xf32>
    %cst = arith.constant dense<0.000000e+00> : vector<48x128xf32>
    %2 = tpu.matmul %1, %0, %cst {dimension_numbers = #tpu.dot_dimension_numbers<[1], [0], [0], [1], [0, 0, 1, 1], [], []>} : vector<48x55xf32>, vector<55x128xf32>, vector<48x128xf32> -> vector<48x128xf32>
    %c0_3 = arith.constant 0 : index
    %c0_4 = arith.constant 0 : index
    %3 = vector.load %arg3[%c0_3, %c0_4] : memref<48x1xf32, #tpu.memory_space<vmem>>, vector<48x1xf32>
    %4 = vector.broadcast %3 : vector<48x1xf32> to vector<48x128xf32>
    %5 = arith.addf %2, %4 : vector<48x128xf32>
    %6 = math.tanh %5 : vector<48x128xf32>
    %c0_5 = arith.constant 0 : index
    %c0_6 = arith.constant 0 : index
    %7 = vector.load %arg4[%c0_5, %c0_6] : memref<32x48xf32, #tpu.memory_space<vmem>>, vector<32x48xf32>
    %cst_7 = arith.constant dense<0.000000e+00> : vector<32x128xf32>
    %8 = tpu.matmul %7, %6, %cst_7 {dimension_numbers = #tpu.dot_dimension_numbers<[1], [0], [0], [1], [0, 0, 1, 1], [], []>} : vector<32x48xf32>, vector<48x128xf32>, vector<32x128xf32> -> vector<32x128xf32>
    %c0_8 = arith.constant 0 : index
    %c0_9 = arith.constant 0 : index
    %9 = vector.load %arg5[%c0_8, %c0_9] : memref<32x1xf32, #tpu.memory_space<vmem>>, vector<32x1xf32>
    %10 = vector.broadcast %9 : vector<32x1xf32> to vector<32x128xf32>
    %11 = arith.addf %8, %10 : vector<32x128xf32>
    %12 = math.tanh %11 : vector<32x128xf32>
    %c0_10 = arith.constant 0 : index
    %c0_11 = arith.constant 0 : index
    %13 = vector.load %arg6[%c0_10, %c0_11] : memref<2x32xf32, #tpu.memory_space<vmem>>, vector<2x32xf32>
    %cst_12 = arith.constant dense<0.000000e+00> : vector<2x128xf32>
    %14 = tpu.matmul %13, %12, %cst_12 {dimension_numbers = #tpu.dot_dimension_numbers<[1], [0], [0], [1], [0, 0, 1, 1], [], []>} : vector<2x32xf32>, vector<32x128xf32>, vector<2x128xf32> -> vector<2x128xf32>
    %c0_13 = arith.constant 0 : index
    %c0_14 = arith.constant 0 : index
    %15 = vector.load %arg7[%c0_13, %c0_14] : memref<2x1xf32, #tpu.memory_space<vmem>>, vector<2x1xf32>
    %16 = vector.broadcast %15 : vector<2x1xf32> to vector<2x128xf32>
    %17 = arith.addf %14, %16 : vector<2x128xf32>
    %c0_15 = arith.constant 0 : index
    %c0_16 = arith.constant 0 : index
    %18 = vector.load %arg8[%c0_15, %c0_16] : memref<2x128xf32, #tpu.memory_space<vmem>>, vector<2x128xf32>
    tpu.vector_store %arg8[%c0_15, %c0_16], %17 {strides = array<i32>} : memref<2x128xf32, #tpu.memory_space<vmem>>, vector<2x128xf32>,
    return
  }
  func.func @transform_0(%arg0: i32) -> (i32, i32) {
    %c0_i32 = arith.constant 0 : i32
    %c0_i32_0 = arith.constant 0 : i32
    return %c0_i32, %arg0 : i32, i32
  }
  func.func @transform_1(%arg0: i32) -> (i32, i32) {
    %c0_i32 = arith.constant 0 : i32
    %c0_i32_0 = arith.constant 0 : i32
    %c0_i32_1 = arith.constant 0 : i32
    return %c0_i32, %c0_i32_0 : i32, i32
  }
  func.func @transform_2(%arg0: i32) -> (i32, i32) {
    %c0_i32 = arith.constant 0 : i32
    %c0_i32_0 = arith.constant 0 : i32
    %c0_i32_1 = arith.constant 0 : i32
    return %c0_i32, %c0_i32_0 : i32, i32
  }
  func.func @transform_3(%arg0: i32) -> (i32, i32) {
    %c0_i32 = arith.constant 0 : i32
    %c0_i32_0 = arith.constant 0 : i32
    %c0_i32_1 = arith.constant 0 : i32
    return %c0_i32, %c0_i32_0 : i32, i32
  }
  func.func @transform_4(%arg0: i32) -> (i32, i32) {
    %c0_i32 = arith.constant 0 : i32
    %c0_i32_0 = arith.constant 0 : i32
    %c0_i32_1 = arith.constant 0 : i32
    return %c0_i32, %c0_i32_0 : i32, i32
  }
  func.func @transform_5(%arg0: i32) -> (i32, i32) {
    %c0_i32 = arith.constant 0 : i32
    %c0_i32_0 = arith.constant 0 : i32
    %c0_i32_1 = arith.constant 0 : i32
    return %c0_i32, %c0_i32_0 : i32, i32
  }
  func.func @transform_6(%arg0: i32) -> (i32, i32) {
    %c0_i32 = arith.constant 0 : i32
    %c0_i32_0 = arith.constant 0 : i32
    %c0_i32_1 = arith.constant 0 : i32
    return %c0_i32, %c0_i32_0 : i32, i32
  }
  func.func @transform_7(%arg0: i32) -> (i32, i32) {
    %c0_i32 = arith.constant 0 : i32
    %c0_i32_0 = arith.constant 0 : i32
    return %c0_i32, %arg0 : i32, i32
  }
}

</mosaic_0001>

<bundles_post_ra>
// kernel: rvtdcnn2_forward.1
= control target key start
LH: loop header
LB: loop body
LE: loop exit
PB: predicated region body
PF: predicated region fallthrough
CT: control target
= control target key end

     0   :  { %12 = vsyncpa [#allocation4], 0  ;;  %s1008_s0 = inlined_call_operand.vmem [shape: f32[55,256], index: 0, kind: input, shape index: {}]   ;;  %s1009_s1 = inlined_call_operand.vmem [shape: f32[48,55], index: 1, kind: input, shape index: {}]   ;;  %s1010_s2 = inlined_call_operand.vmem [shape: f32[48,1], index: 2, kind: input, shape index: {}]   ;;  %s1011_s3 = inlined_call_operand.vmem [shape: f32[32,48], index: 3, kind: input, shape index: {}]   ;;  %s1012_s4 = inlined_call_operand.vmem [shape: f32[32,1], index: 4, kind: input, shape index: {}]   ;;  %s1013_s5 = inlined_call_operand.vmem [shape: f32[2,32], index: 5, kind: input, shape index: {}]   ;;  %s1014_s6 = inlined_call_operand.vmem [shape: f32[2,1], index: 6, kind: input, shape index: {}]   ;;  %s1015_s7 = inlined_call_operand.hbm [shape: f32[2,256], index: 7, kind: output, shape index: {}]  }
   0x1   :  { %14 = vsyncpa [#allocation4 + $0x1], 0  ;;  %s841_s24 = smov 0   ;;  %s843_s25 = smov 0  }
   0x2   :  { %s845_s26 = smov 0   ;;  %s847_s27 = smov 0  }
   0x3 LB: > { %s635_s28 = sadd.s32 4294967295, %s798_s27   ;;  %s636_s29 = sadd.s32 4294967294, %s798_s27   ;;  %s798_s27 = sphi %s847_s27, %s1021_s27   ;;  %s794_s26 = sphi %s845_s26, %s1020_s26   ;;  %s790_s25 = sphi %s843_s25, %s1019_s25   ;;  %s786_s24 = sphi %s841_s24, %s1018_s24  }
   0x4   : > { %s864_s30 = sadd.s32 1, %s798_s27   ;;  %s27_s8 = sadd.s32 1, %s794_s26 }
   0x5   : > { %s24_s9 = ssub.s32 %s798_s27, %s864_s30  ;;  %p34_p0 = scmp.ne.s32.totalorder %s794_s26, %s790_s25 }
   0x6   : > { %p25_p1 = scmp.eq.s32.totalorder %s24_s9, 0  ;;  %p35_p2 = scmp.eq.s32.totalorder %s798_s27, 0 }
   0x7   : > { %p190_p3 = scmp.eq.s32.totalorder %s635_s28, 1  ;;  %p195_p4 = scmp.ne.s32.totalorder %s790_s25, %s786_s24 }
   0x8   : > { %s877_s10 = scalar_select %p25_p1, %s794_s26, %s27_s8  }
   0x9   : > { %p36_p5 = por %p35_p2, %p34_p0  ;;  %p879_p6 = por %p190_p3, %p34_p0 }
   0xa   : > { %p196_p7 = scmp.eq.s32.totalorder %s636_s29, 1  ;;  %p638_p9 = scmp.ge.s32.totalorder %s798_s27, 2 }
   0xc   : > { %p883_p8 = por %p196_p7, %p195_p4  ;;  %230 = sbr.rel (%p638_p9) target bundleno = 28 (0x1c), region = 40 }
  0x11   : > { %233 = sbr.rel (!%p36_p5) target bundleno = 28 (0x1c), region = 44  ;;  %s235_s13 = sand.u32 (%p36_p5), 1, %s794_s26  }
  0x12   : > { %s639_s14 = sshll.u32 (%p36_p5), %s798_s27, 3  ;;  %s671_s15 = smul.u32 (%p36_p5), 56, %s235_s13 }
  0x13   : > { %s239_s18 = scalar_lea.vmem (%p36_p5), %s1008_s0, %s639_s14 }
  0x14   : > { %v280_v0 = vld [vmem:[%s239_s18] sm:$0xff] (%p36_p5)  ;;  %v282_v1 = vld [vmem:[%s239_s18 + $0x10] sm:$0xff] (%p36_p5)  ;;  %s237_s19 = scalar_lea.vmem (%p36_p5), [#allocation2], %s671_s15 }
  0x15   : > { %v284_v2 = vld [vmem:[%s239_s18 + $0x20] sm:$0xff] (%p36_p5)  ;;  %281 = vst [vmem:[%s237_s19] sm:$0xff] (%p36_p5), %v280_v0  ;;  %v286_v3 = vld [vmem:[%s239_s18 + $0x30] sm:$0xff] (%p36_p5) }
  0x16   : > { %283 = vst [vmem:[%s237_s19 + $0x8] sm:$0xff] %v282_v1  ;;  %v288_v4 = vld [vmem:[%s239_s18 + $0x40] sm:$0xff]  ;;  %v290_v5 = vld [vmem:[%s239_s18 + $0x50] sm:$0xff] }
  0x17   : > { %285 = vst [vmem:[%s237_s19 + $0x10] sm:$0xff] %v284_v2  ;;  %v292_v6 = vld [vmem:[%s239_s18 + $0x60] sm:$0xff] }
  0x18   : > { %287 = vst [vmem:[%s237_s19 + $0x18] sm:$0xff] %v286_v3 }
  0x19   : > { %289 = vst [vmem:[%s237_s19 + $0x20] sm:$0xff] %v288_v4 }
  0x1a   : > { %291 = vst [vmem:[%s237_s19 + $0x28] sm:$0xff] %v290_v5 }
  0x1b   : > { %293 = vst [vmem:[%s237_s19 + $0x30] sm:$0xff] %v292_v6 }
  0x1c PF: > { %p640_p10 = scmp.ge.s32.totalorder %s798_s27, 1  ;;  %p298_p11 = scmp.lt.s32.totalorder %s798_s27, 3 }
  0x1e   : > { %p299_p12 = pnand %p640_p10, %p298_p11 }
  0x1f   : > { %s898_s20 = sand.u32 (!%p299_p12), 1, %s790_s25   ;;  %s655_s16 = sshll.u32 (!%p299_p12), %s635_s28, 1 }
  0x20   : > { %302 = sbr.rel (%p299_p12) target bundleno = 514 (0x202), region = 82  ;;  %s641_s15 = sshll.u32 (!%p299_p12), %s898_s20, 1 }
  0x21   : > { %s672_s23 = smul.u32 (!%p299_p12), 56, %s898_s20  ;;  %s566_s18 = scalar_lea.hbm (!%p299_p12), %s1015_s7, %s655_s16 }
  0x22   : > { %s335_s19 = scalar_lea.vmem (!%p299_p12), [#allocation3], %s641_s15  ;;  %s570_s22 = sshll.u32 (!%p299_p12), %s566_s18, 4  ;;  %s571_s22 = int_to_ptr.hbm [resolvable:$true] %s570_s22 }
  0x23   : > { %s307_s9 = scalar_lea.vmem (!%p299_p12), [#allocation2], %s672_s23  ;;  %s568_s21 = sshll.u32 (!%p299_p12), %s335_s19, 4  ;;  %s569_s21 = int_to_ptr.vmem [resolvable:$true] %s568_s21 }
  0x24   : > { %s556_s23 = scalar_lea.sflag (!%p299_p12), [#allocation4], %s898_s20  ;;  %s750_s29 = sshra.s32 (!%p299_p12), %s571_s22, 4  ;;  %s751_s29 = int_to_ptr.hbm [resolvable:$true] %s750_s29 }
  0x25   : > { %v354_v7 = vld [vmem:[%s1010_s2 + $0x28] sm:$0xff]  ;;  %v800_v8 = vmov 0   ;;  %v352_v9 = vld [vmem:[%s1010_s2 + $0x18] sm:$0xff]  ;;  %vm404_vm0 = vcmask 1046528   ;;  %v353_v13 = vld [vmem:[%s1010_s2 + $0x20] sm:$0xff]  ;;  %vm385_vm1 = vcmask 449536   ;;  %p757_p2 = scmp.lt.s32.totalorder %s751_s29, %s1015_s7 }
  0x26   : > { %713 = vset.pattern.permute.xlu0 %v800_v8  ;;  %714 = vset.pattern.permute.xlu1 %v800_v8  ;;  %v342_v10 = vld [vmem:[%s307_s9 + $0x30] sm:$0x7f]  ;;  %v341_v11 = vld [vmem:[%s307_s9 + $0x28] sm:$0xff]  ;;  %v340_v12 = vld [vmem:[%s307_s9 + $0x20] sm:$0xff]  ;;  %vm477_vm2 = vcmask 392192   ;;  %vm530_vm3 = vcmask 261120  }
  0x27   : > { %382 = vperm.xlu0 %713, %v354_v7   ;;  %372 = vperm.xlu1 %714, %v352_v9   ;;  %v351_v14 = vld [vmem:[%s1010_s2 + $0x10] sm:$0xff]  ;;  %v350_v15 = vld [vmem:[%s1010_s2 + $0x8] sm:$0xff]  ;;  %v349_v19 = vld [vmem:[%s1010_s2] sm:$0xff]  ;;  %s752_s8 = scalar_lea.hbm %s751_s29, 2  ;;  %s756_s14 = scalar_lea.hbm %s1015_s7, 4 }
  0x28   : > { %715 = vset.pattern.permute.xlu2 %v800_v8  ;;  %658 = vmatpush.msk.msra.mxu3 %vm404_vm0, %v342_v10  ;;  %v339_v16 = vld [vmem:[%s307_s9 + $0x18] sm:$0xff]  ;;  %v338_v17 = vld [vmem:[%s307_s9 + $0x10] sm:$0xff]  ;;  %v337_v18 = vld [vmem:[%s307_s9 + $0x8] sm:$0xff]  ;;  %p753_p13 = scmp.ne.s32.totalorder %s751_s29, %s752_s8  ;;  %p758_p3 = scmp.lt.s32.totalorder %s756_s14, %s752_s8 }
  0x29   : > { %642 = vmatpush.msk.msra.mxu0 %vm404_vm0, %v342_v10  ;;  %362 = vperm.xlu2 %715, %v350_v15   ;;  %v336_v20 = vld [vmem:[%s307_s9] sm:$0xff]  ;;  %v455_v24 = vld [vmem:[%s1012_s4 + $0x10] sm:$0xff]  ;;  %v454_v25 = vld [vmem:[%s1012_s4 + $0x8] sm:$0xff] }
  0x2a   : > { %659 = vmatpush.msra.mxu3 %v341_v11  ;;  %v346_v21 = vld [vmem:[%s1009_s1 + $0x18] sm:$0xff]  ;;  %v343_v22 = vld [vmem:[%s1009_s1] sm:$0xff]  ;;  %v344_v27 = vld [vmem:[%s1009_s1 + $0x8] sm:$0xff]  ;;  %p754_p0 = pnand %p753_p13, %p879_p6  ;;  %p759_p4 = por %p758_p3, %p757_p2 }
  0x2b   : > { %418 = vmatpush.msra.mxu0 %v341_v11  ;;  %v456_v23 = vld [vmem:[%s1012_s4 + $0x18] sm:$0xff]  ;;  %v347_v26 = vld [vmem:[%s1009_s1 + $0x20] sm:$0xff]  ;;  %v348_v30 = vld [vmem:[%s1009_s1 + $0x28] sm:$0xff] }
  0x2c   : > { %660 = vmatpush.msra.mxu3 %v340_v12  ;;  %v453_v28 = vld [vmem:[%s1012_s4] sm:$0xff]  ;;  %v345_v31 = vld [vmem:[%s1009_s1 + $0x10] sm:$0xff]  ;;  %v452_v56 = vld [vmem:[%s1011_s3 + $0x18] sm:$0xff]  ;;  %p755_p1 = pneg %p754_p0 }
  0x2d   : > { %419 = vmatpush.msra.mxu0 %v340_v12  ;;  %v524_v29 = vld [vmem:[%s1014_s6] sm:$0x3]  ;;  %v450_v58 = vld [vmem:[%s1011_s3 + $0x8] sm:$0xff]  ;;  %v451_v59 = vld [vmem:[%s1011_s3 + $0x10] sm:$0xff] }
  0x2e   : > { %661 = vmatpush.msra.mxu3 %v339_v16  ;;  %v449_v55 = vld [vmem:[%s1011_s3] sm:$0xff]  ;;  %p760_p5 = pnand %p759_p4, %p755_p1 }
  0x2f   : > { %377 = vperm.xlu0 %713, %v353_v13   ;;  %367 = vperm.xlu1 %714, %v351_v14   ;;  %v523_v11 = vld [vmem:[%s1013_s5] sm:$0x3] }
  0x30   : > { %420 = vmatpush.msra.mxu0 %v339_v16  ;;  %662 = vmatpush.msra.mxu3 %v338_v17 }
  0x31   : > { %357 = vperm.xlu2 %715, %v349_v19  }
  0x32   : > { %421 = vmatpush.msra.mxu0 %v338_v17  ;;  %663 = vmatpush.msra.mxu3 %v337_v18 }
  0x34   : > { %422 = vmatpush.msra.mxu0 %v337_v18  ;;  %664 = vmatpush.msra.mxu3 %v336_v20 }
  0x35   : > { %646 = vmatmul.msk.f32.vlgmr.msra.gmra.mxu3 %vm385_vm1, %v346_v21 }
  0x36   : > { %423 = vmatpush.msra.mxu0 %v336_v20 }
  0x37   : > { %643 = vmatmul.msk.f32.vlgmr.msra.gmra.mxu0 %vm385_vm1, %v343_v22  ;;  %474 = vperm.xlu0 %713, %v456_v23  }
  0x38   : > { %469 = vperm.xlu1 %714, %v455_v24  }
  0x39   : > { %464 = vperm.xlu2 %715, %v454_v25  }
  0x3d   : > { %647 = vmatmul.msk.f32.gmra.mxu3 %vm385_vm1, %v347_v26 }
  0x3f   : > { %644 = vmatmul.msk.f32.gmra.mxu0 %vm385_vm1, %v344_v27  ;;  %459 = vperm.xlu0 %713, %v453_v28  }
  0x40   : > { %527 = vperm.xlu1 %714, %v524_v29  }
  0x45   : > { %648 = vmatmul.msk.f32.gmra.mxu3 %vm385_vm1, %v348_v30 }
  0x47   : > { %645 = vmatmul.msk.f32.gmra.mxu0 %vm385_vm1, %v345_v31 }
  0x83   : > { %v363_v38 = vpop.permute.xlu2 %362 }
  0x8b   : > { %v358_v47 = vpop.permute.xlu2 %357 }
  0x93   : > { %v465_v3 = vpop.permute.xlu2 %464 }
  0x99   : > { %v383_v34 = vpop.permute.xlu0 %382  ;;  %v373_v37 = vpop.permute.xlu1 %372 }
  0xa1   : > { %v378_v39 = vpop.permute.xlu0 %377  ;;  %v368_v45 = vpop.permute.xlu1 %367 }
  0xa9   : > { %v475_v61 = vpop.permute.xlu0 %474 }
  0xaa   : > { %v470_v2 = vpop.permute.xlu1 %469 }
  0xb1   : > { %v460_v7 = vpop.permute.xlu0 %459 }
  0xb2   : > { %v528_v13 = vpop.permute.xlu1 %527 }
  0xb4   : > { %v425_v32 = vpop.f32.mrf.mxu0 }
  0xb5   : > { %v426_v50 = vadd.f32 %v425_v32, %v358_v47 }
  0xb8   : > { %v434_v33 = vpop.f32.mrf.mxu3 }
  0xb9   : > { %v435_v44 = vadd.f32 %v434_v33, %v373_v37 }
  0xbc   : > { %v428_v35 = vpop.f32.mrf.mxu0 }
  0xbd   : > { %v429_v48 = vadd.f32 %v428_v35, %v363_v38 }
  0xc0   : > { %v437_v36 = vpop.f32.mrf.mxu3 }
  0xc1   : > { %v438_v41 = vadd.f32 %v437_v36, %v378_v39 }
  0xc4   : > { %v431_v43 = vpop.f32.mrf.mxu0 }
  0xc5   : > { %v432_v46 = vadd.f32 %v431_v43, %v368_v45 }
  0xc8   : > { %v440_v40 = vpop.f32.mrf.mxu3 }
  0xc9   : > { %v441_v42 = vadd.f32 %v440_v40, %v383_v34 }
  0xcb   : > { %716 = vtanh.f32 %v441_v42 }
  0xcc   : > { %718 = vtanh.f32 %v438_v41 }
  0xcd   : > { %720 = vtanh.f32 %v435_v44 }
  0xce   : > { %722 = vtanh.f32 %v432_v46 }
  0xcf   : > { %724 = vtanh.f32 %v429_v48 }
  0xd0   : > { %726 = vtanh.f32 %v426_v50 }
  0xd1   : > { %v717_v49 = vpop.eup %716 }
  0xd2   : > { %500 = vmatpush.msra.mxu1 %v717_v49  ;;  %665 = vmatpush.msra.mxu2 %v717_v49  ;;  %v719_v51 = vpop.eup %718 }
  0xd3   : > { %v721_v52 = vpop.eup %720 }
  0xd4   : > { %501 = vmatpush.msra.mxu1 %v719_v51  ;;  %666 = vmatpush.msra.mxu2 %v719_v51  ;;  %v723_v53 = vpop.eup %722 }
  0xd5   : > { %v725_v54 = vpop.eup %724 }
  0xd6   : > { %502 = vmatpush.msra.mxu1 %v721_v52  ;;  %667 = vmatpush.msra.mxu2 %v721_v52  ;;  %v727_v57 = vpop.eup %726 }
  0xd8   : > { %503 = vmatpush.msra.mxu1 %v723_v53  ;;  %668 = vmatpush.msra.mxu2 %v723_v53 }
  0xda   : > { %504 = vmatpush.msra.mxu1 %v725_v54  ;;  %669 = vmatpush.msra.mxu2 %v725_v54 }
  0xdc   : > { %505 = vmatpush.msra.mxu1 %v727_v57  ;;  %670 = vmatpush.msra.mxu2 %v727_v57 }
  0xdd   : > { %649 = vmatmul.msk.f32.vlgmr.msra.gmra.mxu1 %vm477_vm2, %v449_v55  ;;  %652 = vmatmul.msk.f32.vlgmr.msra.gmra.mxu2 %vm477_vm2, %v452_v56 }
  0xe5   : > { %650 = vmatmul.msk.f32.gmra.mxu1 %vm477_vm2, %v450_v58 }
  0xed   : > { %651 = vmatmul.msk.f32.gmra.mxu1 %vm477_vm2, %v451_v59 }
 0x15a   : > { %v507_v60 = vpop.f32.mrf.mxu1 }
 0x15b   : > { %v508_v8 = vadd.f32 %v507_v60, %v460_v7 }
 0x160   : > { %v516_v62 = vpop.f32.mrf.mxu2 }
 0x161   : > { %v517_v63 = vadd.f32 %v516_v62, %v475_v61 }
 0x162   : > { %v510_v0 = vpop.f32.mrf.mxu1 }
 0x163   : > { %728 = vtanh.f32 %v517_v63  ;;  %v511_v5 = vadd.f32 %v510_v0, %v465_v3 }
 0x169   : > { %v729_v1 = vpop.eup %728 }
 0x16a   : > { %v513_v4 = vpop.f32.mrf.mxu1  ;;  %546 = vmatpush.msrb.mxu2 %v729_v1 }
 0x16b   : > { %v514_v6 = vadd.f32 %v513_v4, %v470_v2 }
 0x16d   : > { %730 = vtanh.f32 %v514_v6 }
 0x16e   : > { %732 = vtanh.f32 %v511_v5 }
 0x16f   : > { %734 = vtanh.f32 %v508_v8 }
 0x173   : > { %v731_v9 = vpop.eup %730 }
 0x174   : > { %547 = vmatpush.msrb.mxu2 %v731_v9  ;;  %v733_v10 = vpop.eup %732 }
 0x175   : > { %v735_v12 = vpop.eup %734 }
 0x176   : > { %548 = vmatpush.msrb.mxu2 %v733_v10 }
 0x178   : > { %549 = vmatpush.msrb.mxu2 %v735_v12 }
 0x179   : > { %653 = vmatmul.msk.f32.vlgmr.msrb.gmra.mxu2 %vm530_vm3, %v523_v11 }
 0x1fc   : > { %v551_v14 = vpop.f32.mrf.mxu2 }
 0x1fd   : > { %v552_v15 = vadd.f32 %v551_v14, %v528_v13 }
 0x1ff   : > { %554 = vst [vmem:[%s335_s19] sm:$0x3] %v552_v15 }
 0x200   : > { %763 = shalt.err (!%p760_p5)
}
 0x201   : > { %673 = dma.vmem_to_hbm [thread:$0]  (%p879_p6), %s569_s21, 32, %s571_s22, %s556_s23  }
 0x202 PF: > { %s582_s20 = sand.u32 1, %s786_s24   ;;  %p676_p7 = pnand %p638_p9, %p883_p8 }
 0x203   : > { %s583_s9 = scalar_lea.sflag [#allocation4], %s582_s20 }
 0x204   : > { %p677_p10 = pneg %p676_p7 }
 0x206   : > { %781 = dma.done.wait (%p677_p10), %s583_s9, 32  }
 0x207   : > { %783 = vsyncadd (%p677_p10), %s583_s9, 4294967264  ;;  %p17_p11 = scmp.ge.s32.totalorder %s864_s30, 4   ;;  %s1018_s24 = smov %s790_s25 }
 0x208   : > { %s1019_s25 = smov %s794_s26  ;;  %s1020_s26 = smov %s877_s10 }
 0x209   : > { %s1021_s27 = smov %s864_s30  ;;  %19 = sbr.rel (!%p17_p11) target bundleno = 3 (0x3), region = 126 }
 0x20e   :  { %589 = vsyncpa [#allocation4], 1 }
 0x20f   :  { %591 = vsyncpa [#allocation4 + $0x1], 1 }

</bundles_post_ra>
